<compile_context>
chip_gen: v6e
topology: v6e:2x2x1
jax: 0.10.0
libtpu: 0.0.40
codegen_flags: <defaults>
</compile_context>

<pallas_src>
import functools

import jax
import jax.numpy as jnp
from jax import lax
from jax.experimental import pallas as pl
from jax.experimental.pallas import tpu as pltpu

EPS = 1e-5
NEG_SLOPE = 0.1


def _round_up(n, m):
    return ((n + m - 1) // m) * m


# -----------------------------------------------------------------------------
# Kernel A: fully VMEM-resident single pass (whole padded batch in one block)
# -----------------------------------------------------------------------------
def ladder_decoder_resident_kernel(xz_ref, w_ref, b_ref, gamma_ref, beta_ref,
                                   o_ref, *, n_rows):
    bp = xz_ref.shape[0]
    h = jnp.dot(xz_ref[...], w_ref[...],
                preferred_element_type=jnp.float32) + b_ref[...]      # [bp, Hp] f32

    if n_rows != bp:   # static: mask batch-padding rows out of the statistics
        row = lax.broadcasted_iota(jnp.int32, (bp, 1), 0)
        mask = (row < n_rows).astype(jnp.float32)
    else:
        mask = None

    inv_n = 1.0 / float(n_rows)
    hv = h if mask is None else h * mask
    mean = jnp.sum(hv, axis=0, keepdims=True) * inv_n                 # [1, Hp]
    d = (h - mean) if mask is None else (h - mean) * mask
    var = jnp.sum(d * d, axis=0, keepdims=True) * inv_n               # biased, centered

    scale = lax.rsqrt(var + EPS) * gamma_ref[...]
    shift = beta_ref[...] - mean * scale
    normed = h * scale + shift
    o_ref[...] = jnp.maximum(normed, NEG_SLOPE * normed).astype(o_ref.dtype)


# -----------------------------------------------------------------------------
# Kernel B: streaming two-phase reduction over batch tiles
# -----------------------------------------------------------------------------
def ladder_decoder_streaming_kernel(xz_ref, w_ref, b_ref, gamma_ref, beta_ref,
                                    o_ref, sum_ref, sumsq_ref, *, n_rows):
    p = pl.program_id(0)          # phase: 0 = accumulate stats, 1 = normalize
    i = pl.program_id(1)          # batch-tile index
    tb = xz_ref.shape[0]

    h = jnp.dot(xz_ref[...], w_ref[...],
                preferred_element_type=jnp.float32) + b_ref[...]      # [tb, Hp] f32

    @pl.when(p == 0)
    def _stats():
        @pl.when(i == 0)
        def _init():
            sum_ref[...] = jnp.zeros_like(sum_ref)
            sumsq_ref[...] = jnp.zeros_like(sumsq_ref)

        if n_rows % tb != 0:       # static: mask batch-padding rows out of stats
            row = i * tb + lax.broadcasted_iota(jnp.int32, (tb, 1), 0)
            hv = h * (row < n_rows).astype(jnp.float32)
        else:
            hv = h
        sum_ref[...] += jnp.sum(hv, axis=0, keepdims=True)
        sumsq_ref[...] += jnp.sum(hv * hv, axis=0, keepdims=True)
        # NOTE: no output write in phase 0 -- the output BlockSpec keeps the
        # block index constant here, so nothing is flushed to HBM.

    @pl.when(p == 1)
    def _normalize():
        @pl.when(i == 0)
        def _finalize():
            inv_n = 1.0 / float(n_rows)
            mean = sum_ref[...] * inv_n
            # TODO(synk): E[h^2]-E[h]^2 can cancel for |mean| >> std; the
            # resident kernel uses a centered two-pass variance instead.
            var = jnp.maximum(sumsq_ref[...] * inv_n - mean * mean, 0.0)
            scale = lax.rsqrt(var + EPS) * gamma_ref[...]
            sum_ref[...] = scale                          # reuse scratch: scale
            sumsq_ref[...] = beta_ref[...] - mean * scale  # reuse scratch: shift

        normed = h * sum_ref[...] + sumsq_ref[...]
        o_ref[...] = jnp.maximum(normed, NEG_SLOPE * normed).astype(o_ref.dtype)


# -----------------------------------------------------------------------------
# One-time parameter preparation (fusion / transpose / pad hoisted out of call)
# -----------------------------------------------------------------------------
def prepare_params(params, compute_dtype=jnp.float32):
    x_dim, in_merge = params["w_merge"].shape
    h_dim = params["w_lin"].shape[0]
    z_dim = in_merge - x_dim
    k = in_merge
    kp = _round_up(k, 128)          # lane-dense K for the single fused dot
    hp = _round_up(h_dim, 128)      # lane-dense output dimension

    # Fuse merge + linear (exact affine composition, done once in f32):
    #   h = cat(x, z) @ (Wm^T @ Wl^T) + (bm @ Wl^T + bl)
    w_eff = (params["w_merge"].T.astype(jnp.float32)
             @ params["w_lin"].T.astype(jnp.float32))                  # [k, h_dim]
    b_eff = (params["b_merge"].astype(jnp.float32)
             @ params["w_lin"].T.astype(jnp.float32)
             + params["b_lin"].astype(jnp.float32))                    # [h_dim]

    w = jnp.zeros((kp, hp), compute_dtype).at[:k, :h_dim].set(
        w_eff.astype(compute_dtype))
    b = jnp.zeros((1, hp), jnp.float32).at[0, :h_dim].set(b_eff)
    gamma = jnp.ones((1, hp), jnp.float32).at[0, :h_dim].set(params["bn_gamma"])
    beta = jnp.zeros((1, hp), jnp.float32).at[0, :h_dim].set(params["bn_beta"])
    return {"w": w, "b": b, "gamma": gamma, "beta": beta,
            "dims": (z_dim, h_dim, x_dim, kp, hp)}


def _vmem_budget_bytes():
    cap = 64 << 20                       # conservative default (v7x per-TC VMEM)
    try:
        cap = int(pltpu.get_tpu_info().vmem_capacity_bytes)
    except Exception:
        pass
    return (cap * 3) // 4                # leave ~25% headroom for the compiler


# -----------------------------------------------------------------------------
# Wrapper
# -----------------------------------------------------------------------------
def ladder_decoder(x, z, prep, *, block_rows=None, force_streaming=False):
    """x: [B, x_dim], z: [B, z_dim].  prep: output of prepare_params()."""
    z_dim, h_dim, x_dim, kp, hp = prep["dims"]
    B = x.shape[0]
    k = x_dim + z_dim
    compute_dtype = prep["w"].dtype
    itemsize = jnp.dtype(compute_dtype).itemsize

    # Pack x|z into one lane-dense slab (zero-padded K -> full-width MXU pass).
    xz = jnp.concatenate([x.astype(compute_dtype), z.astype(compute_dtype)],
                         axis=-1)
    if kp != k:
        xz = jnp.pad(xz, ((0, 0), (0, kp - k)))

    budget = _vmem_budget_bytes()
    weight_bytes = kp * hp * itemsize + 3 * hp * 4

    # ---- fully-resident single-pass path (preferred) ------------------------
    bp_full = _round_up(B, 8)
    resident_bytes = (bp_full * kp * itemsize        # xz
                      + 2 * bp_full * hp * 4         # f32 intermediate + output
                      + weight_bytes)
    if (not force_streaming and block_rows is None
            and resident_bytes * 2 <= budget):
        if bp_full != B:
            xz = jnp.pad(xz, ((0, bp_full - B), (0, 0)))
        kernel = functools.partial(ladder_decoder_resident_kernel, n_rows=B)
        out = pl.pallas_call(
            kernel,
            out_shape=jax.ShapeDtypeStruct((bp_full, hp), jnp.float32),
            compiler_params=pltpu.CompilerParams(
                vmem_limit_bytes=int(min(max(2 * resident_bytes, 8 << 20),
                                         budget))),
            cost_estimate=pl.CostEstimate(
                flops=2 * bp_full * kp * hp,
                transcendentals=hp,
                bytes_accessed=(bp_full * kp * itemsize + weight_bytes
                                + bp_full * hp * 4)),
        )(xz, prep["w"], prep["b"], prep["gamma"], prep["beta"])
        return out[:B, :h_dim]

    # ---- streaming two-phase path --------------------------------------------
    if block_rows is None:
        # Largest batch tile (multiple of 8, <=2048 rows) that fits the budget.
        per_row = 2 * kp * itemsize + 2 * hp * 4 + hp * 4   # dbl-buf in/out + f32 h
        fixed = 2 * weight_bytes + 2 * hp * 4 + (2 << 20)
        block_rows = (budget - fixed) // max(per_row, 1)
        block_rows = max(8, min(2048, (block_rows // 8) * 8))
    tb = max(8, min(_round_up(block_rows, 8), _round_up(B, 8)))
    bp = _round_up(B, tb)
    nt = bp // tb
    if bp != B:
        xz = jnp.pad(xz, ((0, bp - B), (0, 0)))

    act = 2 * tb * kp * itemsize + 2 * tb * hp * 4 + tb * hp * 4
    vmem_limit = int(min(max(act + 2 * weight_bytes + (4 << 20), 8 << 20), budget))
    flops = 2 * 2 * bp * kp * hp            # dot recomputed in both phases
    bytes_accessed = 2 * bp * kp * itemsize + weight_bytes + bp * hp * 4
    kernel = functools.partial(ladder_decoder_streaming_kernel, n_rows=B)

    def call(weight_pipeline_mode):
        def wspec(shape):
            if weight_pipeline_mode is None:
                return pl.BlockSpec(shape, lambda p, i: (0, 0))
            return pl.BlockSpec(shape, lambda p, i: (0, 0),
                                pipeline_mode=weight_pipeline_mode)

        return pl.pallas_call(
            kernel,
            out_shape=jax.ShapeDtypeStruct((bp, hp), jnp.float32),
            grid_spec=pltpu.PrefetchScalarGridSpec(
                num_scalar_prefetch=0,
                grid=(2, nt),                                 # (phase, batch tile)
                in_specs=[
                    pl.BlockSpec((tb, kp), lambda p, i: (i, 0)),   # xz (streamed)
                    wspec((kp, hp)),                               # fused weight
                    wspec((1, hp)),                                # fused bias
                    wspec((1, hp)),                                # gamma
                    wspec((1, hp)),                                # beta
                ],
                # Constant output block index during phase 0: the output slab is
                # flushed to HBM exactly once, by the phase-1 writes.
                out_specs=pl.BlockSpec((tb, hp), lambda p, i: (p * i, 0)),
                scratch_shapes=[
                    pltpu.VMEM((1, hp), jnp.float32),   # sum(h)   -> scale
                    pltpu.VMEM((1, hp), jnp.float32),   # sum(h^2) -> shift
                ],
            ),
            compiler_params=pltpu.CompilerParams(
                dimension_semantics=("arbitrary", "arbitrary"),
                vmem_limit_bytes=vmem_limit,
            ),
            cost_estimate=pl.CostEstimate(
                flops=flops, transcendentals=hp, bytes_accessed=bytes_accessed),
        )(xz, prep["w"], prep["b"], prep["gamma"], prep["beta"])

    try:
        # Single-buffer the VMEM-resident parameters (constant index_map); the
        # block_until_ready surfaces any lowering rejection so we can fall back.
        out = jax.block_until_ready(call(pl.Buffered(1)))
    except Exception:
        out = call(None)    # this JAX build: default double-buffered weights

    return out[:B, :h_dim]


# -----------------------------------------------------------------------------
# Synthetic params + pure-JAX reference (for the self-check)
# -----------------------------------------------------------------------------
def init_params(key, z_dim, h_dim, x_dim):
    kk = jax.random.split(key, 6)
    in_merge = x_dim + z_dim
    return {
        "w_merge": jax.random.normal(kk[0], (x_dim, in_merge), jnp.float32) * 0.1,
        "b_merge": jax.random.normal(kk[1], (x_dim,), jnp.float32) * 0.1,
        "w_lin":   jax.random.normal(kk[2], (h_dim, x_dim), jnp.float32) * 0.1,
        "b_lin":   jax.random.normal(kk[3], (h_dim,), jnp.float32) * 0.1,
        "bn_gamma": jnp.ones((h_dim,), jnp.float32)
                    + 0.01 * jax.random.normal(kk[4], (h_dim,), jnp.float32),
        "bn_beta":  0.01 * jax.random.normal(kk[5], (h_dim,), jnp.float32),
    }


def reference(x, z, params):
    combined = jnp.concatenate([x, z], axis=-1)
    merged = combined @ params["w_merge"].T + params["b_merge"]
    h = merged @ params["w_lin"].T + params["b_lin"]
    mean = h.mean(0, keepdims=True)
    var = ((h - mean) ** 2).mean(0, keepdims=True)
    normed = (h - mean) * lax.rsqrt(var + EPS) * params["bn_gamma"] + params["bn_beta"]
    return jnp.where(normed >= 0, normed, NEG_SLOPE * normed)


if __name__ == "__main__":
    # dims = [z_dim, h_dim, x_dim]
    z_dim, h_dim, x_dim = 8, 32, 16
    key = jax.random.PRNGKey(0)
    kp_ = jax.random.split(key, 5)
    params = init_params(kp_[0], z_dim, h_dim, x_dim)
    prep = prepare_params(params, compute_dtype=jnp.float32)
    # (pass compute_dtype=jnp.bfloat16 on v6e/v7x for the bandwidth-bound
    #  production path; relax the tolerance below accordingly)

    # --- test 1: fully-resident single-pass path (B=12, padded to 16 rows) ---
    B1 = 12
    x1 = jax.random.normal(kp_[1], (B1, x_dim), jnp.float32)
    z1 = jax.random.normal(kp_[2], (B1, z_dim), jnp.float32)
    out1 = jax.block_until_ready(ladder_decoder(x1, z1, prep))
    ref1 = reference(x1, z1, params)
    assert out1.shape == (B1, h_dim)
    assert jnp.allclose(out1, ref1, atol=1e-4, rtol=1e-4), "resident path mismatch"

    # --- test 2: streaming two-phase path (B=52, 16-row tiles, padded to 64) ---
    B2 = 52
    x2 = jax.random.normal(kp_[3], (B2, x_dim), jnp.float32)
    z2 = jax.random.normal(kp_[4], (B2, z_dim), jnp.float32)
    out2 = jax.block_until_ready(
        ladder_decoder(x2, z2, prep, block_rows=16, force_streaming=True))
    ref2 = reference(x2, z2, params)
    assert out2.shape == (B2, h_dim)
    assert jnp.allclose(out2, ref2, atol=1e-4, rtol=1e-4), "streaming path mismatch"

    print("KERNEL_OK")
</pallas_src>

<mosaic_0001>
module attributes {stable_mosaic.version = 11 : i64} {
  func.func @ladder_decoder_resident_kernel(%arg0: memref<16x128xf32, #tpu.memory_space<vmem>>, %arg1: memref<128x128xf32, #tpu.memory_space<vmem>>, %arg2: memref<1x128xf32, #tpu.memory_space<vmem>>, %arg3: memref<1x128xf32, #tpu.memory_space<vmem>>, %arg4: memref<1x128xf32, #tpu.memory_space<vmem>>, %arg5: memref<16x128xf32, #tpu.memory_space<vmem>>) attributes {dimension_semantics = [], scalar_prefetch = 0 : i64, scratch_operands = 0 : i64, tpu.core_type = #tpu.core_type<tc>} {
    %c0 = arith.constant 0 : index
    %c0_0 = arith.constant 0 : index
    %0 = vector.load %arg0[%c0, %c0_0] : memref<16x128xf32, #tpu.memory_space<vmem>>, vector<16x128xf32>
    %c0_1 = arith.constant 0 : index
    %c0_2 = arith.constant 0 : index
    %1 = vector.load %arg1[%c0_1, %c0_2] : memref<128x128xf32, #tpu.memory_space<vmem>>, vector<128x128xf32>
    %cst = arith.constant dense<0.000000e+00> : vector<16x128xf32>
    %2 = tpu.matmul %0, %1, %cst {dimension_numbers = #tpu.dot_dimension_numbers<[1], [0], [0], [1], [0, 0, 1, 1], [], []>} : vector<16x128xf32>, vector<128x128xf32>, vector<16x128xf32> -> vector<16x128xf32>
    %c0_3 = arith.constant 0 : index
    %c0_4 = arith.constant 0 : index
    %3 = vector.load %arg2[%c0_3, %c0_4] : memref<1x128xf32, #tpu.memory_space<vmem>>, vector<1x128xf32>
    %4 = vector.broadcast %3 : vector<1x128xf32> to vector<16x128xf32>
    %5 = arith.addf %2, %4 : vector<16x128xf32>
    %6 = tpu.iota {dimensions = array<i32: 0>} : vector<16x1xi32>
    %c12_i32 = arith.constant 12 : i32
    %7 = vector.broadcast %c12_i32 : i32 to vector<16x1xi32>
    %8 = arith.cmpi slt, %6, %7 : vector<16x1xi32>
    %9 = arith.extui %8 : vector<16x1xi1> to vector<16x1xi32>
    %10 = arith.sitofp %9 : vector<16x1xi32> to vector<16x1xf32>
    %11 = vector.broadcast %10 : vector<16x1xf32> to vector<16x128xf32>
    %12 = arith.mulf %5, %11 : vector<16x128xf32>
    %cst_5 = arith.constant dense<0.000000e+00> : vector<128xf32>
    %13 = vector.multi_reduction <add>, %12, %cst_5 [0] : vector<16x128xf32> to vector<128xf32>
    %14 = vector.shape_cast %13 : vector<128xf32> to vector<1x128xf32>
    %cst_6 = arith.constant 0.0833333358 : f32
    %15 = vector.broadcast %cst_6 : f32 to vector<1x128xf32>
    %16 = arith.mulf %14, %15 : vector<1x128xf32>
    %17 = vector.broadcast %16 : vector<1x128xf32> to vector<16x128xf32>
    %18 = arith.subf %5, %17 : vector<16x128xf32>
    %19 = vector.broadcast %10 : vector<16x1xf32> to vector<16x128xf32>
    %20 = arith.mulf %18, %19 : vector<16x128xf32>
    %21 = arith.mulf %20, %20 : vector<16x128xf32>
    %cst_7 = arith.constant dense<0.000000e+00> : vector<128xf32>
    %22 = vector.multi_reduction <add>, %21, %cst_7 [0] : vector<16x128xf32> to vector<128xf32>
    %23 = vector.shape_cast %22 : vector<128xf32> to vector<1x128xf32>
    %cst_8 = arith.constant 0.0833333358 : f32
    %24 = vector.broadcast %cst_8 : f32 to vector<1x128xf32>
    %25 = arith.mulf %23, %24 : vector<1x128xf32>
    %cst_9 = arith.constant 9.99999974E-6 : f32
    %26 = vector.broadcast %cst_9 : f32 to vector<1x128xf32>
    %27 = arith.addf %25, %26 : vector<1x128xf32>
    %28 = math.rsqrt %27 : vector<1x128xf32>
    %c0_10 = arith.constant 0 : index
    %c0_11 = arith.constant 0 : index
    %29 = vector.load %arg3[%c0_10, %c0_11] : memref<1x128xf32, #tpu.memory_space<vmem>>, vector<1x128xf32>
    %30 = arith.mulf %28, %29 : vector<1x128xf32>
    %c0_12 = arith.constant 0 : index
    %c0_13 = arith.constant 0 : index
    %31 = vector.load %arg4[%c0_12, %c0_13] : memref<1x128xf32, #tpu.memory_space<vmem>>, vector<1x128xf32>
    %32 = arith.mulf %16, %30 : vector<1x128xf32>
    %33 = arith.subf %31, %32 : vector<1x128xf32>
    %34 = vector.broadcast %30 : vector<1x128xf32> to vector<16x128xf32>
    %35 = arith.mulf %5, %34 : vector<16x128xf32>
    %36 = vector.broadcast %33 : vector<1x128xf32> to vector<16x128xf32>
    %37 = arith.addf %35, %36 : vector<16x128xf32>
    %cst_14 = arith.constant 1.000000e-01 : f32
    %38 = vector.broadcast %cst_14 : f32 to vector<16x128xf32>
    %39 = arith.mulf %38, %37 : vector<16x128xf32>
    %40 = arith.maximumf %37, %39 : vector<16x128xf32>
    %c0_15 = arith.constant 0 : index
    %c0_16 = arith.constant 0 : index
    %41 = vector.load %arg5[%c0_15, %c0_16] : memref<16x128xf32, #tpu.memory_space<vmem>>, vector<16x128xf32>
    tpu.vector_store %arg5[%c0_15, %c0_16], %40 {strides = array<i32>} : memref<16x128xf32, #tpu.memory_space<vmem>>, vector<16x128xf32>,
    return
  }
}

</mosaic_0001>

<bundles_post_ra>
// kernel: tpu_custom_call.1
= control target key start
LH: loop header
LB: loop body
LE: loop exit
PB: predicated region body
PF: predicated region fallthrough
CT: control target
= control target key end

     0   :  { %10 = vsyncpa [#allocation3], 0  ;;  %s419_s0 = inlined_call_operand.hbm [shape: f32[16,128], index: 0, kind: input, shape index: {}]   ;;  %s420_s1 = inlined_call_operand.hbm [shape: f32[128,128], index: 1, kind: input, shape index: {}]   ;;  %s421_s2 = inlined_call_operand.vmem [shape: f32[1,128], index: 2, kind: input, shape index: {}]   ;;  %s422_s3 = inlined_call_operand.vmem [shape: f32[1,128], index: 3, kind: input, shape index: {}]   ;;  %s423_s4 = inlined_call_operand.vmem [shape: f32[1,128], index: 4, kind: input, shape index: {}]   ;;  %s424_s5 = inlined_call_operand.hbm [shape: f32[16,128], index: 5, kind: output, shape index: {}]  }
   0x1   :  { %11 = vsyncpa [#allocation6], 0 }
   0x2   :  { %12 = vsyncpa [#allocation4], 0  ;;  %s356_s18 = smov [#allocation2]  }
   0x3   :  { %s18_s19 = sshll.u32 %s356_s18, 4  ;;  %s19_s19 = int_to_ptr.vmem [resolvable:$true] %s18_s19 }
   0x4   :  { %s298_s20 = scalar_lea.vmem %s19_s19, 256  ;;  %p303_p1 = scmp.lt.s32.totalorder %s19_s19, %s19_s19 }
   0x5   :  { %p299_p0 = scmp.ne.s32.totalorder %s19_s19, %s298_s20  ;;  %p304_p2 = scmp.lt.s32.totalorder %s298_s20, %s298_s20 }
   0x7   :  { %p305_p3 = por %p304_p2, %p303_p1 }
   0x9   :  { %p306_p4 = pnand %p305_p3, %p299_p0 }
   0xb   :  { %309 = shalt.err (!%p306_p4)
}
   0xc   :  { %s357_s21 = smov 128   ;;  %s358_s22 = smov 8  }
   0xd   :  { %24 = dma.hbm_to_vmem [thread:$0]  %s419_s0, 256, %s19_s19, [#allocation3], %s357_s21, %s357_s21, %s358_s22  }
   0xe   :  { %s359_s25 = smov [#allocation5]  }
   0xf   :  { %s30_s26 = sshll.u32 %s359_s25, 4  ;;  %s31_s26 = int_to_ptr.vmem [resolvable:$true] %s30_s26 }
  0x10   :  { %s318_s27 = scalar_lea.vmem %s31_s26, 2048  ;;  %p323_p6 = scmp.lt.s32.totalorder %s31_s26, %s31_s26 }
  0x11   :  { %p319_p5 = scmp.ne.s32.totalorder %s31_s26, %s318_s27  ;;  %p324_p7 = scmp.lt.s32.totalorder %s318_s27, %s318_s27 }
  0x13   :  { %p325_p8 = por %p324_p7, %p323_p6 }
  0x15   :  { %p326_p9 = pnand %p325_p8, %p319_p5 }
  0x17   :  { %329 = shalt.err (!%p326_p9)
}
  0x18   :  { %36 = dma.hbm_to_vmem [thread:$0]  %s420_s1, 2048, %s31_s26, [#allocation6], %s357_s21, %s357_s21, %s358_s22  }
  0x19   :  { %350 = dma.done.wait [#allocation3], 256  }
  0x1a   :  { %351 = vsyncadd [#allocation3], 4294967040 }
  0x1b   :  { %352 = dma.done.wait [#allocation6], 2048  }
  0x1c   :  { %353 = vsyncadd [#allocation6], 4294965248  ;;  %v66_v0 = vld [vmem:[#allocation5 + $0x78] sm:$0xff]  ;;  %v65_v1 = vld [vmem:[#allocation5 + $0x70] sm:$0xff]  ;;  %v149_v18 = vlaneseq  ;;  %v360_v23 = vmov 0.0   ;;  %s361_s8 = smov [#allocation7]  }
  0x1d   :  { %247 = vmatprep.subr.mxu0 %v66_v0  ;;  %v64_v2 = vld [vmem:[#allocation5 + $0x68] sm:$0xff]  ;;  %v63_v3 = vld [vmem:[#allocation5 + $0x60] sm:$0xff]  ;;  %v49_v4 = vld [vmem:[#allocation2] sm:$0xff]  ;;  %s214_s9 = sshll.u32 %s361_s8, 4  ;;  %s215_s9 = int_to_ptr.vmem [resolvable:$true] %s214_s9 }
  0x1e   :  { %248 = vmatpush3.msra.mxu0 %v66_v0  ;;  %v62_v5 = vld [vmem:[#allocation5 + $0x58] sm:$0xff]  ;;  %279 = vmatprep.mubr.f32.mxu0 %v49_v4  ;;  %v61_v6 = vld [vmem:[#allocation5 + $0x50] sm:$0xff]  ;;  %v60_v7 = vld [vmem:[#allocation5 + $0x48] sm:$0xff]  ;;  %v150_v19 = vshrl.u32 %v149_v18, 7  ;;  %p335_p11 = scmp.lt.s32.totalorder %s215_s9, %s215_s9 }
  0x1f   :  { %249 = vmatprep.subr.mxu0 %v65_v1  ;;  %v59_v8 = vld [vmem:[#allocation5 + $0x40] sm:$0xff]  ;;  %v58_v9 = vld [vmem:[#allocation5 + $0x38] sm:$0xff]  ;;  %v57_v10 = vld [vmem:[#allocation5 + $0x30] sm:$0xff] }
  0x20   :  { %250 = vmatpush3.msra.mxu0 %v65_v1  ;;  %v56_v11 = vld [vmem:[#allocation5 + $0x28] sm:$0xff]  ;;  %v55_v12 = vld [vmem:[#allocation5 + $0x20] sm:$0xff]  ;;  %v54_v13 = vld [vmem:[#allocation5 + $0x18] sm:$0xff]  ;;  %v151_v20 = vadd.s32 8, %v150_v19  ;;  %v191_v52 = vsub.s32 0, %v150_v19 }
  0x21   :  { %251 = vmatprep.subr.mxu0 %v64_v2  ;;  %v53_v14 = vld [vmem:[#allocation5 + $0x10] sm:$0xff]  ;;  %v52_v15 = vld [vmem:[#allocation5 + $0x8] sm:$0xff]  ;;  %v51_v16 = vld [vmem:[#allocation5] sm:$0xff] }
  0x22   :  { %252 = vmatpush3.msra.mxu0 %v64_v2  ;;  %v50_v17 = vld [vmem:[#allocation2 + $0x8] sm:$0xff]  ;;  %vm153_vm0 = vcmp.lt.s32.totalorder %v151_v20, 12  ;;  %v227_v21 = vld [vmem:[%s421_s2] ss:$0 sm:$0xff] }
  0x23   :  { %253 = vmatprep.subr.mxu0 %v63_v3  ;;  %v228_v24 = vsel %vm153_vm0, 1.0, %v360_v23  ;;  %v184_v51 = vld [vmem:[%s422_s3] sm:$0x1]  ;;  %s330_s3 = scalar_lea.vmem %s215_s9, 256 }
  0x24   :  { %254 = vmatpush3.msra.mxu0 %v63_v3  ;;  %v186_v55 = vld [vmem:[%s423_s4] sm:$0x1]  ;;  %p331_p10 = scmp.ne.s32.totalorder %s215_s9, %s330_s3  ;;  %p336_p12 = scmp.lt.s32.totalorder %s330_s3, %s330_s3 }
  0x25   :  { %255 = vmatprep.subr.mxu0 %v62_v5 }
  0x26   :  { %256 = vmatpush3.msra.mxu0 %v62_v5  ;;  %p337_p13 = por %p336_p12, %p335_p11 }
  0x27   :  { %257 = vmatprep.subr.mxu0 %v61_v6 }
  0x28   :  { %258 = vmatpush3.msra.mxu0 %v61_v6  ;;  %p338_p0 = pnand %p337_p13, %p331_p10 }
  0x29   :  { %259 = vmatprep.subr.mxu0 %v60_v7 }
  0x2a   :  { %260 = vmatpush3.msra.mxu0 %v60_v7 }
  0x2b   :  { %261 = vmatprep.subr.mxu0 %v59_v8 }
  0x2c   :  { %262 = vmatpush3.msra.mxu0 %v59_v8 }
  0x2d   :  { %263 = vmatprep.subr.mxu0 %v58_v9 }
  0x2e   :  { %264 = vmatpush3.msra.mxu0 %v58_v9 }
  0x2f   :  { %265 = vmatprep.subr.mxu0 %v57_v10 }
  0x30   :  { %266 = vmatpush3.msra.mxu0 %v57_v10 }
  0x31   :  { %267 = vmatprep.subr.mxu0 %v56_v11 }
  0x32   :  { %268 = vmatpush3.msra.mxu0 %v56_v11 }
  0x33   :  { %269 = vmatprep.subr.mxu0 %v55_v12 }
  0x34   :  { %270 = vmatpush3.msra.mxu0 %v55_v12 }
  0x35   :  { %271 = vmatprep.subr.mxu0 %v54_v13 }
  0x36   :  { %272 = vmatpush3.msra.mxu0 %v54_v13 }
  0x37   :  { %273 = vmatprep.subr.mxu0 %v53_v14 }
  0x38   :  { %274 = vmatpush3.msra.mxu0 %v53_v14 }
  0x39   :  { %275 = vmatprep.subr.mxu0 %v52_v15 }
  0x3a   :  { %276 = vmatpush3.msra.mxu0 %v52_v15 }
  0x3b   :  { %277 = vmatprep.subr.mxu0 %v51_v16 }
  0x3c   :  { %278 = vmatpush3.msra.mxu0 %v51_v16 }
  0x3d   :  { %280 = vmatmul.mubr.f32.vlgmr.msra.gmra.mxu0 %v50_v17 }
  0xfd   :  { %v281_v22 = vpop.f32.mrf.mxu0 }
  0xfe   :  { %v146_v25 = vadd.f32 %v281_v22, %v227_v21 }
  0xff   :  { %v140_v26 = vpop.f32.mrf.mxu0 }
 0x100   :  { %v159_v27 = vmul.f32 %v228_v24, %v146_v25  ;;  %v141_v28 = vadd.f32 %v227_v21, %v140_v26 }
 0x102   :  { %v160_v29 = vadd.f32 %v159_v27, %v141_v28 }
 0x104   :  { %v161_v30 = vrot.slane %v160_v29, 4 }
 0x106   :  { %v162_v31 = vadd.f32 %v161_v30, %v160_v29 }
 0x108   :  { %v163_v32 = vrot.slane %v162_v31, 2 }
 0x10a   :  { %v164_v33 = vadd.f32 %v163_v32, %v162_v31 }
 0x10c   :  { %v165_v34 = vrot.slane %v164_v33, 1 }
 0x10e   :  { %v166_v35 = vadd.f32 %v165_v34, %v164_v33 }
 0x110   :  { %v167_v36 = vmul.f32 0.083333336, %v166_v35 }
 0x112   :  { %v168_v37 = vsub.f32 %v141_v28, %v167_v36  ;;  %v169_v38 = vsub.f32 %v146_v25, %v167_v36 }
 0x114   :  { %v171_v39 = vmul.f32 %v228_v24, %v169_v38  ;;  %v172_v40 = vmul.f32 %v168_v37, %v168_v37 }
 0x116   :  { %v173_v41 = vmul.f32 %v171_v39, %v171_v39 }
 0x118   :  { %v174_v42 = vadd.f32 %v173_v41, %v172_v40 }
 0x11a   :  { %v175_v43 = vrot.slane %v174_v42, 4 }
 0x11c   :  { %v176_v44 = vadd.f32 %v175_v43, %v174_v42 }
 0x11e   :  { %v177_v45 = vrot.slane %v176_v44, 2 }
 0x120   :  { %v178_v46 = vadd.f32 %v177_v45, %v176_v44 }
 0x122   :  { %v179_v47 = vrot.slane %v178_v46, 1 }
 0x124   :  { %v180_v48 = vadd.f32 %v179_v47, %v178_v46 }
 0x126   :  { %v181_v49 = vmul.f32 0.083333336, %v180_v48 }
 0x128   :  { %v182_v50 = vadd.f32 1e-05, %v181_v49 }
 0x12a   :  { %288 = vrsqrt.f32 %v182_v50 }
 0x137   :  { %v289_v53 = vpop.eup %288 }
 0x138   :  { %v185_v54 = vmul.f32 %v289_v53, %v184_v51 }
 0x13a   :  { %v187_v56 = vmul.f32 %v185_v54, %v167_v36  ;;  %v192_v57 = vrot.slane %v185_v54, %v191_v52 }
 0x13c   :  { %v188_v58 = vsub.f32 %v186_v55, %v187_v56  ;;  %v193_v59 = vmul.f32 %v192_v57, %v141_v28  ;;  %v194_v60 = vmul.f32 %v192_v57, %v146_v25 }
 0x13e   :  { %v199_v61 = vrot.slane %v188_v58, %v191_v52 }
 0x140   :  { %v201_v62 = vadd.f32 %v199_v61, %v193_v59  ;;  %v202_v63 = vadd.f32 %v199_v61, %v194_v60 }
 0x142   :  { %v203_v0 = vmul.f32 0.1, %v201_v62  ;;  %v204_v1 = vmul.f32 0.1, %v202_v63 }
 0x144   :  { %v205_v2 = vmax.f32 %v201_v62, %v203_v0  ;;  %v206_v3 = vmax.f32 %v202_v63, %v204_v1 }
 0x146   :  { %207 = vst [vmem:[#allocation7] sm:$0xff] %v205_v2  ;;  %208 = vst [vmem:[#allocation7 + $0x8] sm:$0xff] %v206_v3 }
 0x147   :  { %341 = shalt.err (!%p338_p0)
}
 0x148   :  { %220 = dma.vmem_to_hbm [thread:$0]  %s215_s9, 256, %s424_s5, [#allocation4], %s357_s21, %s357_s21, %s358_s22  }
 0x149   :  { %354 = dma.done.wait [#allocation4], 256  }
 0x14a   :  { %355 = vsyncadd [#allocation4], 4294967040 }
 0x14b   :  { %224 = vsyncpa [#allocation3], 1 }
 0x14c   :  { %225 = vsyncpa [#allocation6], 1 }
 0x14d   :  { %226 = vsyncpa [#allocation4], 1 }

</bundles_post_ra>
